<compile_context>
chip_gen: v6e
topology: v6e:2x2x1
jax: 0.10.0
libtpu: 0.0.40
codegen_flags: <defaults>
</compile_context>

<pallas_src>
import jax
import jax.numpy as jnp
from jax.experimental import pallas as pl
from jax.experimental.pallas import tpu as pltpu


def _context_kernel(seg_ref, vecs_ref, wt_ref, bias_ref, ctx_ref, emb_ref):
    # seg_ref : (1, R)   int32 — block-local segment id per object: b_local*N + pred_to_img
    # vecs_ref: (R, Dp)  bf16  — lane-padded GCN vectors for the Bblk graphs of this step
    # wt_ref  : (Dp, Kp) bf16  — fc weight^T, zero-padded (shared across steps)
    # bias_ref: (1, Kp)  f32   — fc bias, zero-padded (shared across steps)
    # ctx_ref : (S, Dp)  f32   — pooled context slab (lane-dense store)
    # emb_ref : (S, Kp)  f32   — embedding slab       (lane-dense store)
    S = ctx_ref.shape[0]
    R = vecs_ref.shape[0]

    # Block-diagonal one-hot built once per step (no per-graph loop, hoisted iota):
    #   onehot[s, r] = 1  iff  segment_id(object r) == s
    rows = jax.lax.broadcasted_iota(jnp.int32, (S, R), 0)        # (S, R) int32
    onehot = (rows == seg_ref[...]).astype(jnp.bfloat16)         # single cast

    # scatter_add == segment sum == one-hot MXU matmul (f32 accumulation).
    ctx = jnp.dot(onehot, vecs_ref[...],
                  preferred_element_type=jnp.float32)            # (S, Dp) f32
    ctx_ref[...] = ctx                                           # dense 128-lane store

    # fc applied to the pooled context (faithful to torch: fc(scatter_add(...))).
    emb_ref[...] = jnp.dot(ctx.astype(jnp.bfloat16), wt_ref[...],
                           preferred_element_type=jnp.float32) + bias_ref[...]
    # torch module also computes relu(embedding) but never returns it; omitted.


def _choose_graphs_per_step(B, O, N, Dp, Kp, vmem_budget_bytes=8 << 20):
    """Largest Bblk that (a) divides B, (b) keeps the double-buffered per-step
    blocks within a conservative VMEM budget (sized for v7x: 64 MiB physical /
    32 MiB scoped default, well below v5e/v6e's 128 MiB), and (c) if the batch
    is actually split across steps, keeps the sublane dims (Bblk*O, Bblk*N)
    multiples of 8 per the BlockSpec tiling rules."""
    per_graph = 2 * (O * Dp * 2 + O * 4 + N * (Dp + Kp) * 4)  # dbl-buffered in+out bytes
    cap = max(1, min(B, int(vmem_budget_bytes // max(per_graph, 1))))
    for bblk in range(cap, 0, -1):
        if B % bblk:
            continue
        if bblk == B or ((bblk * O) % 8 == 0 and (bblk * N) % 8 == 0):
            return bblk
    return B  # single step: full-array blocks are always a legal tiling


def context_forward_batched(vecs, pred_to_img, weight, bias, num_images,
                            graphs_per_step=None):
    """Batched Context forward.

    vecs:        (B, O, D) float
    pred_to_img: (B, O)    int, values in [0, num_images)
    weight:      (K, D)    fc weight (torch nn.Linear layout)
    bias:        (K,)      fc bias
    num_images:  static int N (from graph metadata — never a device .max())

    Returns (context (B, N, D), embedding (B, N, K)).
    """
    B, O, D = vecs.shape
    K = weight.shape[0]
    N = int(num_images)

    # Lane-dense (multiple-of-128) widths for both MXU RHS operands and outputs.
    Dp = pl.cdiv(D, 128) * 128
    Kp = pl.cdiv(K, 128) * 128

    if graphs_per_step is None:
        graphs_per_step = _choose_graphs_per_step(B, O, N, Dp, Kp)
    Bblk = graphs_per_step
    assert B % Bblk == 0, "graphs_per_step must divide the batch"
    G = B // Bblk        # grid steps
    R = Bblk * O         # objects handled per step (one-hot contraction width)
    S = Bblk * N         # output segments produced per step

    # Block-local segment ids: seg[b, o] = (b % Bblk) * N + pred_to_img[b, o].
    # NOTE: indices outside [0, N) are silently dropped by the one-hot (torch
    # scatter_add would fault); graph metadata must guarantee the range.
    local_b = (jnp.arange(B, dtype=jnp.int32) % Bblk)[:, None]
    seg = (pred_to_img.astype(jnp.int32) + local_b * N).reshape(G, R)

    # Zero-padded bf16 MXU operands (layout plumbing done in the wrapper).
    vecs_pad = jnp.pad(vecs.reshape(B * O, D).astype(jnp.bfloat16),
                       ((0, 0), (0, Dp - D)))                     # (B*O, Dp)
    wt_pad = jnp.pad(weight.T.astype(jnp.bfloat16),
                     ((0, Dp - D), (0, Kp - K)))                  # (Dp, Kp)
    bias_pad = jnp.pad(bias.astype(jnp.float32).reshape(1, K),
                       ((0, 0), (0, Kp - K)))                     # (1, Kp)

    flops = G * (2 * S * R * Dp + 2 * S * Dp * Kp)
    bytes_accessed = (seg.size * 4 + vecs_pad.size * 2 + wt_pad.size * 2
                      + bias_pad.size * 4 + B * N * (Dp + Kp) * 4)

    ctx_out, emb_out = pl.pallas_call(
        _context_kernel,
        out_shape=(jax.ShapeDtypeStruct((B * N, Dp), jnp.float32),
                   jax.ShapeDtypeStruct((B * N, Kp), jnp.float32)),
        grid=(G,),
        in_specs=[
            pl.BlockSpec((1, R), lambda g: (g, 0)),     # per-step segment ids
            pl.BlockSpec((R, Dp), lambda g: (g, 0)),    # per-step padded vectors
            pl.BlockSpec((Dp, Kp), lambda g: (0, 0)),   # shared padded weight^T
            pl.BlockSpec((1, Kp), lambda g: (0, 0)),    # shared padded bias
        ],
        out_specs=(pl.BlockSpec((S, Dp), lambda g: (g, 0)),
                   pl.BlockSpec((S, Kp), lambda g: (g, 0))),
        compiler_params=pltpu.CompilerParams(
            # single step: nothing to shard across TensorCores; multi-step: parallel.
            dimension_semantics=("arbitrary",) if G == 1 else ("parallel",)),
        cost_estimate=pl.CostEstimate(flops=flops, transcendentals=0,
                                      bytes_accessed=bytes_accessed),
    )(seg, vecs_pad, wt_pad, bias_pad)

    context = ctx_out[:, :D].reshape(B, N, D).astype(vecs.dtype)
    embedding = emb_out[:, :K].reshape(B, N, K).astype(vecs.dtype)
    return context, embedding


def context_forward(vecs, pred_to_img, weight, bias, num_images):
    """Single-graph forward matching the torch module signature.
    vecs: (O, D); pred_to_img: (O,).  Returns (context (N, D), embedding (N, K))."""
    ctx, emb = context_forward_batched(vecs[None], pred_to_img[None],
                                       weight, bias, num_images)
    return ctx[0], emb[0]


if __name__ == "__main__":
    # Small shapes consistent with Context(input_dim, output_dim).
    input_dim, output_dim = 32, 8
    B, O = 2, 8
    N = 3   # static: known from graph metadata, NOT computed via device .max()
    # TODO(synk): torch derives N dynamically via pred_to_img.max()+1 (a
    # device->host sync); here it is required as static metadata.

    key = jax.random.PRNGKey(0)
    k_vec, k_w, k_b = jax.random.split(key, 3)

    vecs = jax.random.normal(k_vec, (B, O, input_dim), dtype=jnp.float32)
    pred_to_img = jnp.array([[0, 1, 0, 2, 1, 0, 2, 1],
                             [2, 2, 1, 0, 0, 1, 1, 2]], dtype=jnp.int32)

    # Deterministic in-script params; shapes from nn.Linear(input_dim, output_dim).
    weight = jax.random.normal(k_w, (output_dim, input_dim), dtype=jnp.float32) * 0.1
    bias = jax.random.normal(k_b, (output_dim,), dtype=jnp.float32) * 0.1

    # Batched path: whole batch folded into a single grid step.
    ctx_b, emb_b = context_forward_batched(vecs, pred_to_img, weight, bias, N)
    # Single-graph path (same signature as the torch module forward).
    ctx_0, emb_0 = context_forward(vecs[0], pred_to_img[0], weight, bias, N)
    jax.block_until_ready((ctx_b, emb_b, ctx_0, emb_0))

    # Pure-JAX f32 reference (scatter_add == segment_sum; fc == x @ W^T + b).
    # bf16 MXU operands -> loosened tolerance; f32 accumulation keeps it tight.
    ok = True
    for b in range(B):
        ctx_ref = jax.ops.segment_sum(vecs[b], pred_to_img[b], num_segments=N)
        emb_ref = ctx_ref @ weight.T + bias
        ok &= bool(jnp.allclose(ctx_b[b], ctx_ref, atol=5e-2, rtol=5e-2))
        ok &= bool(jnp.allclose(emb_b[b], emb_ref, atol=5e-2, rtol=5e-2))
    ctx_ref0 = jax.ops.segment_sum(vecs[0], pred_to_img[0], num_segments=N)
    emb_ref0 = ctx_ref0 @ weight.T + bias
    ok &= bool(jnp.allclose(ctx_0, ctx_ref0, atol=5e-2, rtol=5e-2))
    ok &= bool(jnp.allclose(emb_0, emb_ref0, atol=5e-2, rtol=5e-2))
    assert ok, "context/embedding mismatch"

    print("KERNEL_OK")
</pallas_src>

<mosaic_0001>
module attributes {stable_mosaic.version = 11 : i64} {
  func.func @_context_kernel(%arg0: i32, %arg1: memref<1x16xi32, #tpu.memory_space<vmem>>, %arg2: memref<16x128xbf16, #tpu.memory_space<vmem>>, %arg3: memref<128x128xbf16, #tpu.memory_space<vmem>>, %arg4: memref<1x128xf32, #tpu.memory_space<vmem>>, %arg5: memref<6x128xf32, #tpu.memory_space<vmem>>, %arg6: memref<6x128xf32, #tpu.memory_space<vmem>>) attributes {dimension_semantics = [#tpu.dimension_semantics<arbitrary>], iteration_bounds = array<i64: 1>, scalar_prefetch = 0 : i64, scratch_operands = 0 : i64, tpu.core_type = #tpu.core_type<tc>, window_params = [{transform_indices = @transform_0, window_bounds = array<i64: 1, 16>}, {transform_indices = @transform_1, window_bounds = array<i64: 16, 128>}, {pipeline_mode = #tpu.pipeline_mode<synchronous>, transform_indices = @transform_2, window_bounds = array<i64: 128, 128>}, {pipeline_mode = #tpu.pipeline_mode<synchronous>, transform_indices = @transform_3, window_bounds = array<i64: 1, 128>}, {transform_indices = @transform_4, window_bounds = array<i64: 6, 128>}, {transform_indices = @transform_5, window_bounds = array<i64: 6, 128>}]} {
    %0 = tpu.iota {dimensions = array<i32: 0>} : vector<6x16xi32>
    %c0 = arith.constant 0 : index
    %c0_0 = arith.constant 0 : index
    %1 = vector.load %arg1[%c0, %c0_0] : memref<1x16xi32, #tpu.memory_space<vmem>>, vector<1x16xi32>
    %2 = vector.broadcast %1 : vector<1x16xi32> to vector<6x16xi32>
    %3 = arith.cmpi eq, %0, %2 : vector<6x16xi32>
    %4 = arith.extui %3 : vector<6x16xi1> to vector<6x16xi32>
    %5 = arith.sitofp %4 : vector<6x16xi32> to vector<6x16xf32>
    %6 = arith.truncf %5 : vector<6x16xf32> to vector<6x16xbf16>
    %c0_1 = arith.constant 0 : index
    %c0_2 = arith.constant 0 : index
    %7 = vector.load %arg2[%c0_1, %c0_2] : memref<16x128xbf16, #tpu.memory_space<vmem>>, vector<16x128xbf16>
    %cst = arith.constant dense<0.000000e+00> : vector<6x128xf32>
    %8 = tpu.matmul %6, %7, %cst {dimension_numbers = #tpu.dot_dimension_numbers<[1], [0], [0], [1], [0, 0, 1, 1], [], []>} : vector<6x16xbf16>, vector<16x128xbf16>, vector<6x128xf32> -> vector<6x128xf32>
    %c0_3 = arith.constant 0 : index
    %c0_4 = arith.constant 0 : index
    %9 = vector.load %arg5[%c0_3, %c0_4] : memref<6x128xf32, #tpu.memory_space<vmem>>, vector<6x128xf32>
    tpu.vector_store %arg5[%c0_3, %c0_4], %8 {strides = array<i32>} : memref<6x128xf32, #tpu.memory_space<vmem>>, vector<6x128xf32>,
    %10 = arith.truncf %8 : vector<6x128xf32> to vector<6x128xbf16>
    %c0_5 = arith.constant 0 : index
    %c0_6 = arith.constant 0 : index
    %11 = vector.load %arg3[%c0_5, %c0_6] : memref<128x128xbf16, #tpu.memory_space<vmem>>, vector<128x128xbf16>
    %cst_7 = arith.constant dense<0.000000e+00> : vector<6x128xf32>
    %12 = tpu.matmul %10, %11, %cst_7 {dimension_numbers = #tpu.dot_dimension_numbers<[1], [0], [0], [1], [0, 0, 1, 1], [], []>} : vector<6x128xbf16>, vector<128x128xbf16>, vector<6x128xf32> -> vector<6x128xf32>
    %c0_8 = arith.constant 0 : index
    %c0_9 = arith.constant 0 : index
    %13 = vector.load %arg4[%c0_8, %c0_9] : memref<1x128xf32, #tpu.memory_space<vmem>>, vector<1x128xf32>
    %14 = vector.broadcast %13 : vector<1x128xf32> to vector<6x128xf32>
    %15 = arith.addf %12, %14 : vector<6x128xf32>
    %c0_10 = arith.constant 0 : index
    %c0_11 = arith.constant 0 : index
    %16 = vector.load %arg6[%c0_10, %c0_11] : memref<6x128xf32, #tpu.memory_space<vmem>>, vector<6x128xf32>
    tpu.vector_store %arg6[%c0_10, %c0_11], %15 {strides = array<i32>} : memref<6x128xf32, #tpu.memory_space<vmem>>, vector<6x128xf32>,
    return
  }
  func.func @transform_0(%arg0: i32) -> (i32, i32) {
    %c0_i32 = arith.constant 0 : i32
    %c0_i32_0 = arith.constant 0 : i32
    return %arg0, %c0_i32 : i32, i32
  }
  func.func @transform_1(%arg0: i32) -> (i32, i32) {
    %c0_i32 = arith.constant 0 : i32
    %c0_i32_0 = arith.constant 0 : i32
    return %arg0, %c0_i32 : i32, i32
  }
  func.func @transform_2(%arg0: i32) -> (i32, i32) {
    %c0_i32 = arith.constant 0 : i32
    %c0_i32_0 = arith.constant 0 : i32
    %c0_i32_1 = arith.constant 0 : i32
    return %c0_i32, %c0_i32_0 : i32, i32
  }
  func.func @transform_3(%arg0: i32) -> (i32, i32) {
    %c0_i32 = arith.constant 0 : i32
    %c0_i32_0 = arith.constant 0 : i32
    %c0_i32_1 = arith.constant 0 : i32
    return %c0_i32, %c0_i32_0 : i32, i32
  }
  func.func @transform_4(%arg0: i32) -> (i32, i32) {
    %c0_i32 = arith.constant 0 : i32
    %c0_i32_0 = arith.constant 0 : i32
    return %arg0, %c0_i32 : i32, i32
  }
  func.func @transform_5(%arg0: i32) -> (i32, i32) {
    %c0_i32 = arith.constant 0 : i32
    %c0_i32_0 = arith.constant 0 : i32
    return %arg0, %c0_i32 : i32, i32
  }
}

</mosaic_0001>

<bundles_post_ra>
// kernel: tpu_custom_call.1
= control target key start
LH: loop header
LB: loop body
LE: loop exit
PB: predicated region body
PF: predicated region fallthrough
CT: control target
= control target key end

     0   :  { %11 = vsyncpa [#allocation3], 0  ;;  %s501_s0 = inlined_call_operand.hbm [shape: s32[1,16], index: 0, kind: input, shape index: {}]   ;;  %s502_s1 = inlined_call_operand.hbm [shape: bf16[16,128], index: 1, kind: input, shape index: {}]   ;;  %s503_s2 = inlined_call_operand.hbm [shape: bf16[128,128], index: 2, kind: input, shape index: {}]   ;;  %s504_s3 = inlined_call_operand.vmem [shape: f32[1,128], index: 3, kind: input, shape index: {}]   ;;  %s505_s4 = inlined_call_operand.hbm [shape: f32[6,128], index: 4, kind: output, shape index: {0}]   ;;  %s506_s5 = inlined_call_operand.hbm [shape: f32[6,128], index: 5, kind: output, shape index: {1}]  }
   0x1   :  { %12 = vsyncpa [#allocation6], 0 }
   0x2   :  { %13 = vsyncpa [#allocation4], 0 }
   0x3   :  { %14 = vsyncpa [#allocation10], 0  ;;  %s444_s18 = smov [#allocation5]  }
   0x4   :  { %s30_s19 = sshll.u32 %s444_s18, 4  ;;  %s31_s19 = int_to_ptr.vmem [resolvable:$true] %s30_s19 }
   0x5   :  { %s344_s20 = scalar_lea.vmem %s31_s19, 128  ;;  %p349_p1 = scmp.lt.s32.totalorder %s31_s19, %s31_s19 }
   0x6   :  { %p345_p0 = scmp.ne.s32.totalorder %s31_s19, %s344_s20  ;;  %p350_p2 = scmp.lt.s32.totalorder %s344_s20, %s344_s20 }
   0x8   :  { %p351_p3 = por %p350_p2, %p349_p1 }
   0xa   :  { %p352_p4 = pnand %p351_p3, %p345_p0 }
   0xc   :  { %355 = shalt.err (!%p352_p4)
}
   0xd   :  { %s445_s21 = smov 64   ;;  %s446_s22 = smov 4  }
   0xe   :  { %36 = dma.hbm_to_vmem [thread:$0]  %s502_s1, 128, %s31_s19, [#allocation6], %s445_s21, %s445_s21, %s446_s22  }
   0xf   :  { %s447_s25 = smov [#allocation2]   ;;  %s448_s27 = smov [#allocation7]  }
  0x10   :  { %s21_s26 = sshll.u32 %s447_s25, 4  ;;  %s42_s28 = sshll.u32 %s448_s27, 4  ;;  %s22_s26 = int_to_ptr.vmem [resolvable:$true] %s21_s26  ;;  %s43_s28 = int_to_ptr.vmem [resolvable:$true] %s42_s28 }
  0x11   :  { %s364_s29 = scalar_lea.vmem %s22_s26, 16  ;;  %s368_s30 = scalar_lea.vmem %s22_s26, 32 }
  0x12   :  { %p365_p5 = scmp.ne.s32.totalorder %s22_s26, %s364_s29  ;;  %p369_p6 = scmp.lt.s32.totalorder %s22_s26, %s22_s26 }
  0x13   :  { %p370_p7 = scmp.lt.s32.totalorder %s368_s30, %s364_s29 }
  0x15   :  { %p371_p8 = por %p370_p7, %p369_p6 }
  0x17   :  { %p372_p9 = pnand %p371_p8, %p365_p5 }
  0x19   :  { %375 = shalt.err (!%p372_p9)
}
  0x1a   :  { %24 = dma.hbm_to_vmem [thread:$0]  %s501_s0, 16, %s22_s26, [#allocation3]  }
  0x1b   :  { %s384_s8 = scalar_lea.vmem %s43_s28, 1024  ;;  %p389_p11 = scmp.lt.s32.totalorder %s43_s28, %s43_s28 }
  0x1c   :  { %p385_p10 = scmp.ne.s32.totalorder %s43_s28, %s384_s8  ;;  %p390_p12 = scmp.lt.s32.totalorder %s384_s8, %s384_s8 }
  0x1e   :  { %p391_p13 = por %p390_p12, %p389_p11 }
  0x20   :  { %p392_p0 = pnand %p391_p13, %p385_p10 }
  0x22   :  { %395 = shalt.err (!%p392_p0)
}
  0x23   :  { %48 = dma.hbm_to_vmem [thread:$0]  %s503_s2, 1024, %s43_s28, [#allocation6], %s445_s21, %s445_s21, %s446_s22  }
  0x24   :  { %436 = dma.done.wait [#allocation3], 16  }
  0x25   :  { %437 = vsyncadd [#allocation3], 4294967280 }
  0x26   :  { %438 = dma.done.wait [#allocation6], 1152  }
  0x27   :  { %439 = vsyncadd [#allocation6], 4294966144  ;;  %v449_v0 = vmov 0.0   ;;  %vm450_vm0 = vmmov 0   ;;  %v61_v1 = vlaneseq  ;;  %v327_v3 = vld [vmem:[#allocation5] sm:$0xff]   ;;  %vm80_vm2 = vcmask 130048  }
  0x28   :  { %292 = vmatprep.subr.bf16.mxu0 %v449_v0  ;;  %294 = vmatprep.mubr.msk.bf16.mxu0 %vm450_vm0, %v449_v0  ;;  %v268_v4 = vld [vmem:[#allocation2] ss:$0 sm:$0xff]  ;;  %v328_v5 = vld [vmem:[#allocation7 + $0x38] sm:$0xff]   ;;  %v330_v9 = vld [vmem:[#allocation7 + $0x28] sm:$0xff]   ;;  %s451_s0 = smov [#allocation8]  }
  0x29   :  { %298 = vmatprep.subr.bf16.mxu1 %v449_v0  ;;  %314 = vmatprep.mubr.msk.bf16.mxu1 %vm450_vm0, %v449_v0  ;;  %v62_v2 = vshrl.u32 %v61_v1, 7  ;;  %v329_v8 = vld [vmem:[#allocation7 + $0x30] sm:$0xff]   ;;  %v331_v10 = vld [vmem:[#allocation7 + $0x20] sm:$0xff]   ;;  %v332_v11 = vld [vmem:[#allocation7 + $0x18] sm:$0xff]   ;;  %s244_s2 = sshll.u32 %s451_s0, 4  ;;  %s245_s2 = int_to_ptr.vmem [resolvable:$true] %s244_s2 }
  0x2a   :  { %293 = vmatpush3.bf16.msra.mxu0 %v327_v3  ;;  %299 = vmatpush3.bf16.msra.mxu1 %v328_v5  ;;  %v333_v12 = vld [vmem:[#allocation7 + $0x10] sm:$0xff]   ;;  %v334_v13 = vld [vmem:[#allocation7 + $0x8] sm:$0xff]   ;;  %v335_v14 = vld [vmem:[#allocation7] sm:$0xff]   ;;  %s396_s10 = scalar_lea.vmem %s245_s2, 128  ;;  %p401_p2 = scmp.lt.s32.totalorder %s245_s2, %s245_s2 }
  0x2b   :  { %vm68_vm1 = vcmp.eq.s32.totalorder %v62_v2, %v268_v4  ;;  %300 = vmatprep.subr.bf16.mxu1 %v449_v0  ;;  %p397_p1 = scmp.ne.s32.totalorder %s245_s2, %s396_s10  ;;  %p402_p3 = scmp.lt.s32.totalorder %s396_s10, %s396_s10 }
  0x2c   :  { %v269_v6 = vsel %vm68_vm1, 1.0, %v449_v0 }
  0x2d   :  { %v71_v7 = vpack.c.bf16 %v269_v6, %v269_v6  ;;  %p403_p4 = por %p402_p3, %p401_p2 }
  0x2e   :  { %301 = vmatpush3.bf16.msra.mxu1 %v329_v8 }
  0x2f   :  { %295 = vmatmul.mubr.msk.bf16.vlgmr.msra.gmra.mxu0 %vm80_vm2, %v71_v7  ;;  %302 = vmatprep.subr.bf16.mxu1 %v449_v0  ;;  %p404_p5 = pnand %p403_p4, %p397_p1 }
  0x32   :  { %303 = vmatpush3.bf16.msra.mxu1 %v330_v9 }
  0x33   :  { %304 = vmatprep.subr.bf16.mxu1 %v449_v0 }
  0x36   :  { %305 = vmatpush3.bf16.msra.mxu1 %v331_v10 }
  0x37   :  { %306 = vmatprep.subr.bf16.mxu1 %v449_v0 }
  0x3a   :  { %307 = vmatpush3.bf16.msra.mxu1 %v332_v11 }
  0x3b   :  { %308 = vmatprep.subr.bf16.mxu1 %v449_v0 }
  0x3e   :  { %309 = vmatpush3.bf16.msra.mxu1 %v333_v12 }
  0x3f   :  { %310 = vmatprep.subr.bf16.mxu1 %v449_v0 }
  0x42   :  { %311 = vmatpush3.bf16.msra.mxu1 %v334_v13 }
  0x43   :  { %312 = vmatprep.subr.bf16.mxu1 %v449_v0 }
  0x46   :  { %313 = vmatpush3.bf16.msra.mxu1 %v335_v14 }
  0xef   :  { %v118_v15 = vpop.f32.mrf.mxu0 }
  0xf0   :  { %v125_v16 = vpack.c.bf16 %v118_v15, %v118_v15  ;;  %124 = vst [vmem:[#allocation8] sm:$0x3f] %v118_v15 }
  0xf1   :  { %v296_v17 = vpop.f32.mrf.mxu0 }
  0xf2   :  { %315 = vmatmul.mubr.bf16.vlgmr.msra.gmra.mxu1 %v125_v16 }
  0xf3   :  { %v121_v18 = vpop.f32.mrf.mxu0 }
  0xf5   :  { %v297_v19 = vpop.f32.mrf.mxu0 }
  0xf6   :  { %407 = shalt.err (!%p404_p5)
}
  0xf7   :  { %247 = dma.vmem_to_hbm [thread:$0]  %s245_s2, 128, %s505_s4, [#allocation4]   ;;  %v272_v20 = vld [vmem:[%s504_s3] ss:$0 sm:$0xff] }
  0xf8   :  { %s452_s15 = smov [#allocation9]  }
  0xf9   :  { %s254_s16 = sshll.u32 %s452_s15, 4  ;;  %s255_s16 = int_to_ptr.vmem [resolvable:$true] %s254_s16 }
  0xfa   :  { %s416_s17 = scalar_lea.vmem %s255_s16, 128  ;;  %p421_p7 = scmp.lt.s32.totalorder %s255_s16, %s255_s16 }
  0xfb   :  { %p417_p6 = scmp.ne.s32.totalorder %s255_s16, %s416_s17  ;;  %p422_p8 = scmp.lt.s32.totalorder %s416_s17, %s416_s17 }
  0xfd   :  { %p423_p9 = por %p422_p8, %p421_p7 }
  0xff   :  { %p424_p10 = pnand %p423_p9, %p417_p6 }
 0x1b2   :  { %v231_v21 = vpop.f32.mrf.mxu1 }
 0x1b3   :  { %v232_v22 = vadd.f32 %v272_v20, %v231_v21 }
 0x1b4   :  { %v316_v23 = vpop.f32.mrf.mxu1 }
 0x1b5   :  { %237 = vst [vmem:[#allocation9] sm:$0x3f] %v232_v22 }
 0x1b6   :  { %v234_v24 = vpop.f32.mrf.mxu1 }
 0x1b7   :  { %427 = shalt.err (!%p424_p10)
}
 0x1b8   :  { %257 = dma.vmem_to_hbm [thread:$0]  %s255_s16, 128, %s506_s5, [#allocation10]   ;;  %v317_v25 = vpop.f32.mrf.mxu1 }
 0x1b9   :  { %440 = dma.done.wait [#allocation4], 128  }
 0x1ba   :  { %441 = vsyncadd [#allocation4], 4294967168 }
 0x1bb   :  { %442 = dma.done.wait [#allocation10], 128  }
 0x1bc   :  { %443 = vsyncadd [#allocation10], 4294967168 }
 0x1bd   :  { %264 = vsyncpa [#allocation3], 1 }
 0x1be   :  { %265 = vsyncpa [#allocation6], 1 }
 0x1bf   :  { %266 = vsyncpa [#allocation4], 1 }
 0x1c0   :  { %267 = vsyncpa [#allocation10], 1 }

</bundles_post_ra>
